<compile_context>
chip_gen: v5e
topology: v5e:2x2
jax: 0.10.0
libtpu: 0.0.40
codegen_flags: <defaults>
</compile_context>

<pallas_src>
import functools

import jax
import jax.numpy as jnp
from jax.experimental import pallas as pl
from jax.experimental.pallas import tpu as pltpu

LANE = 128  # TPU lane width: keep all feature (last) dims lane-dense.


def _round_up(x, m):
    return ((x + m - 1) // m) * m


def _mlp_kernel(x_ref, w1_ref, b1_ref, w2_ref, b2_ref, w3_ref, b3_ref, o_ref):
    """Fused 3-layer MLP. Matmuls on the MXU (f32 accumulation); bias + ReLU on the
    f32 accumulator (VPU). All lane dims are pre-padded to 128 -> lane-dense stores."""
    x = x_ref[...]
    cdt = x.dtype  # compute dtype for MXU inputs (bf16 by default)

    h1 = jnp.dot(x, w1_ref[...], preferred_element_type=jnp.float32) + b1_ref[...]
    h1 = jnp.maximum(h1, 0.0)

    h2 = jnp.dot(h1.astype(cdt), w2_ref[...],
                 preferred_element_type=jnp.float32) + b2_ref[...]
    h2 = jnp.maximum(h2, 0.0)

    out = jnp.dot(h2.astype(cdt), w3_ref[...],
                  preferred_element_type=jnp.float32) + b3_ref[...]
    o_ref[...] = out.astype(o_ref.dtype)


@functools.partial(jax.jit, static_argnames=("tile_b", "compute_dtype"))
def linear_compression(x, params, *, tile_b=None, compute_dtype=jnp.bfloat16):
    """x: (B, D_in) float32. params: dict of w1,b1,w2,b2,w3,b3 (w: (in,out), b: (1,out))."""
    B, D_in = x.shape
    H1 = params["w1"].shape[1]
    H2 = params["w2"].shape[1]
    F = params["w3"].shape[1]

    # --- lane padding (math-preserving: padded lanes carry zero weights/biases) ---
    H1p = _round_up(H1, LANE)
    H2p = _round_up(H2, LANE)
    Fp = _round_up(F, LANE)

    w1 = jnp.pad(params["w1"], ((0, 0), (0, H1p - H1))).astype(compute_dtype)
    w2 = jnp.pad(params["w2"], ((0, H1p - H1), (0, H2p - H2))).astype(compute_dtype)
    w3 = jnp.pad(params["w3"], ((0, H2p - H2), (0, Fp - F))).astype(compute_dtype)
    # Biases stay f32: the add happens on the f32 accumulator (free on v5e too).
    b1 = jnp.pad(params["b1"].reshape(1, H1), ((0, 0), (0, H1p - H1))).astype(jnp.float32)
    b2 = jnp.pad(params["b2"].reshape(1, H2), ((0, 0), (0, H2p - H2))).astype(jnp.float32)
    b3 = jnp.pad(params["b3"].reshape(1, F), ((0, 0), (0, Fp - F))).astype(jnp.float32)

    xc = x.astype(compute_dtype)

    # --- batch tiling: sublane-aligned tiles, grid >= 2 when the batch allows ---
    itemsize = jnp.dtype(compute_dtype).itemsize
    sub = 8 * (4 // itemsize)  # 8 rows/sublane for f32, 16 for bf16
    if tile_b is None:
        b_aligned = _round_up(B, sub)
        tile_b = min(1024, max(sub, _round_up(pl.cdiv(b_aligned, 2), sub)))
    assert tile_b % sub == 0, f"tile_b must be a multiple of {sub} for {compute_dtype}"

    Bp = _round_up(B, tile_b)
    if Bp != B:
        xc = jnp.pad(xc, ((0, Bp - B), (0, 0)))  # zero rows flow through harmlessly

    grid = (Bp // tile_b,)

    def rep(shape):  # weights/biases: one full-array block, resident across the grid
        return pl.BlockSpec(shape, lambda i: tuple(0 for _ in shape))
    # TODO(synk): single-buffer the constant weight specs (pipeline_mode=pl.Buffered(1))
    # to drop their redundant second VMEM buffer; usage is already far below the limit.

    flops = 2 * B * (D_in * H1 + H1 * H2 + H2 * F)
    bytes_accessed = int(
        xc.size * xc.dtype.itemsize
        + Bp * Fp * x.dtype.itemsize
        + sum(a.size * a.dtype.itemsize for a in (w1, b1, w2, b2, w3, b3))
    )
    cost = pl.CostEstimate(flops=flops, transcendentals=0, bytes_accessed=bytes_accessed)

    out = pl.pallas_call(
        _mlp_kernel,
        out_shape=jax.ShapeDtypeStruct((Bp, Fp), x.dtype),
        grid_spec=pltpu.PrefetchScalarGridSpec(
            num_scalar_prefetch=0,
            grid=grid,
            in_specs=[
                pl.BlockSpec((tile_b, D_in), lambda i: (i, 0)),  # x tile
                rep((D_in, H1p)),  # w1
                rep((1, H1p)),     # b1
                rep((H1p, H2p)),   # w2
                rep((1, H2p)),     # b2
                rep((H2p, Fp)),    # w3
                rep((1, Fp)),      # b3
            ],
            out_specs=pl.BlockSpec((tile_b, Fp), lambda i: (i, 0)),
        ),
        compiler_params=pltpu.CompilerParams(
            dimension_semantics=("parallel",),
            vmem_limit_bytes=32 * 1024 * 1024,  # safe on v5e/v6e/v7x; usage is far below
        ),
        cost_estimate=cost,
    )(xc, w1, b1, w2, b2, w3, b3)

    return out[:B, :F]


def init_params(key, d_in, n_features, h=10):
    # PyTorch-Linear-style init: U(-1/sqrt(fan_in), 1/sqrt(fan_in)).
    def linear_init(k, fan_in, fan_out):
        kw, kb = jax.random.split(k)
        bound = 1.0 / jnp.sqrt(fan_in)
        w = jax.random.uniform(kw, (fan_in, fan_out), jnp.float32, -bound, bound)
        b = jax.random.uniform(kb, (1, fan_out), jnp.float32, -bound, bound)
        return w, b

    k1, k2, k3 = jax.random.split(key, 3)
    w1, b1 = linear_init(k1, d_in, h)
    w2, b2 = linear_init(k2, h, h)
    w3, b3 = linear_init(k3, h, n_features)
    return {"w1": w1, "b1": b1, "w2": w2, "b2": b2, "w3": w3, "b3": b3}


def _reference(x, p, compute_dtype=jnp.bfloat16):
    # Same numerics as the kernel: bf16 MXU inputs, f32 accumulation + epilogue.
    cdt = compute_dtype
    h1 = jnp.maximum(
        jnp.dot(x.astype(cdt), p["w1"].astype(cdt),
                preferred_element_type=jnp.float32) + p["b1"], 0.0)
    h2 = jnp.maximum(
        jnp.dot(h1.astype(cdt), p["w2"].astype(cdt),
                preferred_element_type=jnp.float32) + p["b2"], 0.0)
    return jnp.dot(h2.astype(cdt), p["w3"].astype(cdt),
                   preferred_element_type=jnp.float32) + p["b3"]


if __name__ == "__main__":
    key = jax.random.PRNGKey(0)
    k_x, k_p = jax.random.split(key)

    batch = 8
    d_in = 32        # LazyLinear infers in_features from the first input
    n_features = 8

    x = jax.random.normal(k_x, (batch, d_in), jnp.float32)
    params = init_params(k_p, d_in, n_features)

    out = linear_compression(x, params)
    out = jax.block_until_ready(out)

    ref = _reference(x, params)
    assert out.shape == (batch, n_features), out.shape
    assert jnp.allclose(out, ref, atol=1e-3, rtol=1e-3), float(jnp.max(jnp.abs(out - ref)))

    print("KERNEL_OK")
</pallas_src>

<mosaic_0001>
module attributes {stable_mosaic.version = 11 : i64} {
  func.func @_mlp_kernel(%arg0: i32, %arg1: memref<16x32xbf16, #tpu.memory_space<vmem>>, %arg2: memref<32x128xbf16, #tpu.memory_space<vmem>>, %arg3: memref<1x128xf32, #tpu.memory_space<vmem>>, %arg4: memref<128x128xbf16, #tpu.memory_space<vmem>>, %arg5: memref<1x128xf32, #tpu.memory_space<vmem>>, %arg6: memref<128x128xbf16, #tpu.memory_space<vmem>>, %arg7: memref<1x128xf32, #tpu.memory_space<vmem>>, %arg8: memref<16x128xf32, #tpu.memory_space<vmem>>) attributes {dimension_semantics = [#tpu.dimension_semantics<parallel>], iteration_bounds = array<i64: 1>, scalar_prefetch = 0 : i64, scratch_operands = 0 : i64, tpu.core_type = #tpu.core_type<tc>, window_params = [{transform_indices = @transform_0, window_bounds = array<i64: 16, 32>}, {pipeline_mode = #tpu.pipeline_mode<synchronous>, transform_indices = @transform_1, window_bounds = array<i64: 32, 128>}, {pipeline_mode = #tpu.pipeline_mode<synchronous>, transform_indices = @transform_2, window_bounds = array<i64: 1, 128>}, {pipeline_mode = #tpu.pipeline_mode<synchronous>, transform_indices = @transform_3, window_bounds = array<i64: 128, 128>}, {pipeline_mode = #tpu.pipeline_mode<synchronous>, transform_indices = @transform_4, window_bounds = array<i64: 1, 128>}, {pipeline_mode = #tpu.pipeline_mode<synchronous>, transform_indices = @transform_5, window_bounds = array<i64: 128, 128>}, {pipeline_mode = #tpu.pipeline_mode<synchronous>, transform_indices = @transform_6, window_bounds = array<i64: 1, 128>}, {transform_indices = @transform_7, window_bounds = array<i64: 16, 128>}]} {
    %c0 = arith.constant 0 : index
    %c0_0 = arith.constant 0 : index
    %0 = vector.load %arg1[%c0, %c0_0] : memref<16x32xbf16, #tpu.memory_space<vmem>>, vector<16x32xbf16>
    %c0_1 = arith.constant 0 : index
    %c0_2 = arith.constant 0 : index
    %1 = vector.load %arg2[%c0_1, %c0_2] : memref<32x128xbf16, #tpu.memory_space<vmem>>, vector<32x128xbf16>
    %cst = arith.constant dense<0.000000e+00> : vector<16x128xf32>
    %2 = tpu.matmul %0, %1, %cst {dimension_numbers = #tpu.dot_dimension_numbers<[1], [0], [0], [1], [0, 0, 1, 1], [], []>} : vector<16x32xbf16>, vector<32x128xbf16>, vector<16x128xf32> -> vector<16x128xf32>
    %c0_3 = arith.constant 0 : index
    %c0_4 = arith.constant 0 : index
    %3 = vector.load %arg3[%c0_3, %c0_4] : memref<1x128xf32, #tpu.memory_space<vmem>>, vector<1x128xf32>
    %4 = vector.broadcast %3 : vector<1x128xf32> to vector<16x128xf32>
    %5 = arith.addf %2, %4 : vector<16x128xf32>
    %cst_5 = arith.constant 0.000000e+00 : f32
    %6 = vector.broadcast %cst_5 : f32 to vector<16x128xf32>
    %7 = arith.maximumf %5, %6 : vector<16x128xf32>
    %8 = arith.truncf %7 : vector<16x128xf32> to vector<16x128xbf16>
    %c0_6 = arith.constant 0 : index
    %c0_7 = arith.constant 0 : index
    %9 = vector.load %arg4[%c0_6, %c0_7] : memref<128x128xbf16, #tpu.memory_space<vmem>>, vector<128x128xbf16>
    %cst_8 = arith.constant dense<0.000000e+00> : vector<16x128xf32>
    %10 = tpu.matmul %8, %9, %cst_8 {dimension_numbers = #tpu.dot_dimension_numbers<[1], [0], [0], [1], [0, 0, 1, 1], [], []>} : vector<16x128xbf16>, vector<128x128xbf16>, vector<16x128xf32> -> vector<16x128xf32>
    %c0_9 = arith.constant 0 : index
    %c0_10 = arith.constant 0 : index
    %11 = vector.load %arg5[%c0_9, %c0_10] : memref<1x128xf32, #tpu.memory_space<vmem>>, vector<1x128xf32>
    %12 = vector.broadcast %11 : vector<1x128xf32> to vector<16x128xf32>
    %13 = arith.addf %10, %12 : vector<16x128xf32>
    %cst_11 = arith.constant 0.000000e+00 : f32
    %14 = vector.broadcast %cst_11 : f32 to vector<16x128xf32>
    %15 = arith.maximumf %13, %14 : vector<16x128xf32>
    %16 = arith.truncf %15 : vector<16x128xf32> to vector<16x128xbf16>
    %c0_12 = arith.constant 0 : index
    %c0_13 = arith.constant 0 : index
    %17 = vector.load %arg6[%c0_12, %c0_13] : memref<128x128xbf16, #tpu.memory_space<vmem>>, vector<128x128xbf16>
    %cst_14 = arith.constant dense<0.000000e+00> : vector<16x128xf32>
    %18 = tpu.matmul %16, %17, %cst_14 {dimension_numbers = #tpu.dot_dimension_numbers<[1], [0], [0], [1], [0, 0, 1, 1], [], []>} : vector<16x128xbf16>, vector<128x128xbf16>, vector<16x128xf32> -> vector<16x128xf32>
    %c0_15 = arith.constant 0 : index
    %c0_16 = arith.constant 0 : index
    %19 = vector.load %arg7[%c0_15, %c0_16] : memref<1x128xf32, #tpu.memory_space<vmem>>, vector<1x128xf32>
    %20 = vector.broadcast %19 : vector<1x128xf32> to vector<16x128xf32>
    %21 = arith.addf %18, %20 : vector<16x128xf32>
    %c0_17 = arith.constant 0 : index
    %c0_18 = arith.constant 0 : index
    %22 = vector.load %arg8[%c0_17, %c0_18] : memref<16x128xf32, #tpu.memory_space<vmem>>, vector<16x128xf32>
    tpu.vector_store %arg8[%c0_17, %c0_18], %21 {strides = array<i32>} : memref<16x128xf32, #tpu.memory_space<vmem>>, vector<16x128xf32>,
    return
  }
  func.func @transform_0(%arg0: i32) -> (i32, i32) {
    %c0_i32 = arith.constant 0 : i32
    %c0_i32_0 = arith.constant 0 : i32
    return %arg0, %c0_i32 : i32, i32
  }
  func.func @transform_1(%arg0: i32) -> (i32, i32) {
    %c0_i32 = arith.constant 0 : i32
    %c0_i32_0 = arith.constant 0 : i32
    %c0_i32_1 = arith.constant 0 : i32
    return %c0_i32, %c0_i32_0 : i32, i32
  }
  func.func @transform_2(%arg0: i32) -> (i32, i32) {
    %c0_i32 = arith.constant 0 : i32
    %c0_i32_0 = arith.constant 0 : i32
    %c0_i32_1 = arith.constant 0 : i32
    return %c0_i32, %c0_i32_0 : i32, i32
  }
  func.func @transform_3(%arg0: i32) -> (i32, i32) {
    %c0_i32 = arith.constant 0 : i32
    %c0_i32_0 = arith.constant 0 : i32
    %c0_i32_1 = arith.constant 0 : i32
    return %c0_i32, %c0_i32_0 : i32, i32
  }
  func.func @transform_4(%arg0: i32) -> (i32, i32) {
    %c0_i32 = arith.constant 0 : i32
    %c0_i32_0 = arith.constant 0 : i32
    %c0_i32_1 = arith.constant 0 : i32
    return %c0_i32, %c0_i32_0 : i32, i32
  }
  func.func @transform_5(%arg0: i32) -> (i32, i32) {
    %c0_i32 = arith.constant 0 : i32
    %c0_i32_0 = arith.constant 0 : i32
    %c0_i32_1 = arith.constant 0 : i32
    return %c0_i32, %c0_i32_0 : i32, i32
  }
  func.func @transform_6(%arg0: i32) -> (i32, i32) {
    %c0_i32 = arith.constant 0 : i32
    %c0_i32_0 = arith.constant 0 : i32
    %c0_i32_1 = arith.constant 0 : i32
    return %c0_i32, %c0_i32_0 : i32, i32
  }
  func.func @transform_7(%arg0: i32) -> (i32, i32) {
    %c0_i32 = arith.constant 0 : i32
    %c0_i32_0 = arith.constant 0 : i32
    return %arg0, %c0_i32 : i32, i32
  }
}

</mosaic_0001>

<bundles_post_ra>
// kernel: linear_compression.1
= control target key start
LH: loop header
LB: loop body
LE: loop exit
PB: predicated region body
PF: predicated region fallthrough
CT: control target
= control target key end

     0   :  { %vm54_vm0 = vcmask 261120   ;;  %s459_s1 = inlined_call_operand.vmem [shape: bf16[32,128], index: 1, kind: input, shape index: {}]   ;;  %s460_s3 = inlined_call_operand.vmem [shape: bf16[128,128], index: 3, kind: input, shape index: {}]   ;;  %s461_s2 = inlined_call_operand.vmem [shape: f32[1,128], index: 2, kind: input, shape index: {}]   ;;  %s462_s0 = inlined_call_operand.vmem [shape: bf16[16,32], index: 0, kind: input, shape index: {}]   ;;  %s463_s4 = inlined_call_operand.vmem [shape: f32[1,128], index: 4, kind: input, shape index: {}]   ;;  %s464_s5 = inlined_call_operand.vmem [shape: bf16[128,128], index: 5, kind: input, shape index: {}]   ;;  %s465_s6 = inlined_call_operand.vmem [shape: f32[1,128], index: 6, kind: input, shape index: {}]   ;;  %s466_s7 = inlined_call_operand.vmem [shape: f32[16,128], index: 7, kind: output, shape index: {}]  }
   0x1   :  { %v327_v0 = vld [vmem:[%s459_s1 + $0x8] sm:$0xff]  ;;  %v335_v1 = vld [vmem:[%s460_s3 + $0x38] sm:$0xff]  ;;  %v326_v2 = vld [vmem:[%s459_s1] sm:$0xff] }
   0x2   :  { %64 = vmatpush.bf16.msra.mxu0 %v327_v0  ;;  %143 = vmatpush.bf16.msra.mxu1 %v335_v1  ;;  %v334_v3 = vld [vmem:[%s460_s3 + $0x30] sm:$0xff]  ;;  %v325_v4 = vld [vmem:[%s462_s0] sm:$0xff]  ;;  %v333_v5 = vld [vmem:[%s460_s3 + $0x28] sm:$0xff] }
   0x3   :  { %v332_v6 = vld [vmem:[%s460_s3 + $0x20] sm:$0xff]  ;;  %v331_v7 = vld [vmem:[%s460_s3 + $0x18] sm:$0xff]  ;;  %v330_v8 = vld [vmem:[%s460_s3 + $0x10] sm:$0xff] }
   0x4   :  { %v329_v9 = vld [vmem:[%s460_s3 + $0x8] sm:$0xff]  ;;  %v328_v10 = vld [vmem:[%s460_s3] sm:$0xff]  ;;  %v343_v11 = vld [vmem:[%s464_s5 + $0x38] sm:$0xff] }
   0x5   :  { %228 = vmatpush.bf16.msra.mxu2 %v343_v11  ;;  %v342_v12 = vld [vmem:[%s464_s5 + $0x30] sm:$0xff]  ;;  %v341_v13 = vld [vmem:[%s464_s5 + $0x28] sm:$0xff]  ;;  %v340_v14 = vld [vmem:[%s464_s5 + $0x20] sm:$0xff] }
   0x6   :  { %65 = vmatpush.bf16.msra.mxu0 %v326_v2  ;;  %144 = vmatpush.bf16.msra.mxu1 %v334_v3  ;;  %v344_v16 = vld [vmem:[%s461_s2] ss:$0 sm:$0xff]  ;;  %v339_v23 = vld [vmem:[%s464_s5 + $0x18] sm:$0xff]  ;;  %v338_v24 = vld [vmem:[%s464_s5 + $0x10] sm:$0xff] }
   0x7   :  { %v337_v25 = vld [vmem:[%s464_s5 + $0x8] sm:$0xff]  ;;  %v336_v26 = vld [vmem:[%s464_s5] sm:$0xff] }
   0x8   :  { %v345_v28 = vld [vmem:[%s463_s4] ss:$0 sm:$0xff] }
   0x9   :  { %260 = vmatmul.msk.bf16.vlgmr.msra.gmra.mxu0 %vm54_vm0, %v325_v4  ;;  %229 = vmatpush.bf16.msra.mxu2 %v342_v12  ;;  %v346_v35 = vld [vmem:[%s465_s6] ss:$0 sm:$0xff] }
   0xa   :  { %145 = vmatpush.bf16.msra.mxu1 %v333_v5 }
   0xd   :  { %230 = vmatpush.bf16.msra.mxu2 %v341_v13 }
   0xe   :  { %146 = vmatpush.bf16.msra.mxu1 %v332_v6 }
  0x11   :  { %231 = vmatpush.bf16.msra.mxu2 %v340_v14 }
  0x12   :  { %147 = vmatpush.bf16.msra.mxu1 %v331_v7 }
  0x15   :  { %232 = vmatpush.bf16.msra.mxu2 %v339_v23 }
  0x16   :  { %148 = vmatpush.bf16.msra.mxu1 %v330_v8 }
  0x19   :  { %233 = vmatpush.bf16.msra.mxu2 %v338_v24 }
  0x1a   :  { %149 = vmatpush.bf16.msra.mxu1 %v329_v9 }
  0x1d   :  { %234 = vmatpush.bf16.msra.mxu2 %v337_v25 }
  0x1e   :  { %150 = vmatpush.bf16.msra.mxu1 %v328_v10 }
  0x21   :  { %235 = vmatpush.bf16.msra.mxu2 %v336_v26 }
  0x86   :  { %v67_v15 = vpop.f32.mrf.mxu0 }
  0x87   :  { %v68_v17 = vadd.f32 %v344_v16, %v67_v15 }
  0x89   :  { %v72_v20 = vmax.f32 %v68_v17, 0.0 }
  0x8e   :  { %v69_v18 = vpop.f32.mrf.mxu0 }
  0x8f   :  { %v70_v19 = vadd.f32 %v344_v16, %v69_v18 }
  0x91   :  { %v73_v21 = vmax.f32 %v70_v19, 0.0 }
  0x93   :  { %v74_v22 = vpack.c.bf16 %v73_v21, %v72_v20 }
  0x95   :  { %151 = vmatmul.bf16.vlgmr.msra.gmra.mxu1 %v74_v22 }
 0x112   :  { %v152_v27 = vpop.f32.mrf.mxu1 }
 0x113   :  { %v153_v29 = vadd.f32 %v345_v28, %v152_v27 }
 0x115   :  { %v157_v32 = vmax.f32 %v153_v29, 0.0 }
 0x11a   :  { %v154_v30 = vpop.f32.mrf.mxu1 }
 0x11b   :  { %v155_v31 = vadd.f32 %v345_v28, %v154_v30 }
 0x11d   :  { %v158_v33 = vmax.f32 %v155_v31, 0.0 }
 0x11f   :  { %v159_v34 = vpack.c.bf16 %v158_v33, %v157_v32 }
 0x121   :  { %236 = vmatmul.bf16.vlgmr.msra.gmra.mxu2 %v159_v34 }
 0x1a4   :  { %v237_v36 = vpop.f32.mrf.mxu2 }
 0x1a5   :  { %v238_v37 = vadd.f32 %v346_v35, %v237_v36 }
 0x1a7   :  { %242 = vst [vmem:[%s466_s7] sm:$0xff] %v238_v37 }
 0x1ac   :  { %v239_v38 = vpop.f32.mrf.mxu2 }
 0x1ad   :  { %v240_v39 = vadd.f32 %v346_v35, %v239_v38 }
 0x1af   :  { %243 = vst [vmem:[%s466_s7 + $0x8] sm:$0xff] %v240_v39 }

</bundles_post_ra>
